<compile_context>
chip_gen: v7x
topology: tpu7x:2x2x1
jax: 0.10.0
libtpu: 0.0.40
codegen_flags: <defaults>
</compile_context>

<pallas_src>
import jax
import jax.numpy as jnp
from jax import lax
from jax.experimental import pallas as pl
from jax.experimental.pallas import tpu as pltpu

_LANE = 128
_LOG_CLAMP = -100.0              # torch.nn.BCELoss clamps log() at -100
_EPS = 0.5                       # RuzickaSimilarity epsilon
_TARGET_BLOCK_BYTES = 2 << 20    # per-input VMEM block (Pallas double-buffers it)
_UNROLL_MAX = 16                 # fully unroll the chunk loop up to this many chunks


def _round_up(x, m):
    return -(-x // m) * m


def _elem_terms(o, t):
    """Fused elementwise terms: BCE integrand, min(o, t), o + t (all f32 / VALU+EUP)."""
    log_o = jnp.maximum(jnp.log(o), _LOG_CLAMP)
    log_1mo = jnp.maximum(jnp.log(1.0 - o), _LOG_CLAMP)
    bce = log_1mo + t * (log_o - log_1mo)        # == t*log(o) + (1-t)*log(1-o)
    return bce, jnp.minimum(o, t), o + t


def _col_update(bb, bce, mn, st):
    """Reduce three (bb, W) partials over lanes and pack them as one (bb, 3) update."""
    s_bce = jnp.sum(bce, axis=-1, keepdims=True)
    s_min = jnp.sum(mn, axis=-1, keepdims=True)
    s_sum = jnp.sum(st, axis=-1, keepdims=True)
    col = lax.broadcasted_iota(jnp.int32, (bb, 3), 1)
    return (jnp.where(col == 0, s_bce, 0.0)
            + jnp.where(col == 1, s_min, 0.0)
            + jnp.where(col == 2, s_sum, 0.0))


def _make_kernel(*, BB, CH, K, K_SUB, NFULL, NFULL_LAST, REM, W_REM):
    unrolled = NFULL <= _UNROLL_MAX

    def kernel(o_ref, t_ref, out_ref):
        s = pl.program_id(0)
        kk = pl.program_id(2)
        kg = s * K_SUB + kk                       # global feature-block index

        @pl.when(kk == 0)
        def _init():
            out_ref[...] = jnp.zeros((BB, 3), jnp.float32)

        if unrolled:
            # Static offsets, fully unrolled; chunks past the valid range of the
            # last block are zeroed (zero contribution, see masking note above).
            acc_b = jnp.zeros((BB, CH), jnp.float32)
            acc_m = jnp.zeros((BB, CH), jnp.float32)
            acc_s = jnp.zeros((BB, CH), jnp.float32)
            for c in range(NFULL):
                off = c * CH
                o = o_ref[:, off:off + CH].astype(jnp.float32)
                t = t_ref[:, off:off + CH].astype(jnp.float32)
                if K > 1 and c >= NFULL_LAST:
                    live = kg < K - 1             # chunk invalid only in the last block
                    o = jnp.where(live, o, 0.0)
                    t = jnp.where(live, t, 0.0)
                bce, mn, st = _elem_terms(o, t)
                acc_b += bce
                acc_m += mn
                acc_s += st
        else:
            def body(c, carry):
                a_b, a_m, a_s = carry
                off = pl.multiple_of(c * CH, _LANE)
                o = o_ref[:, pl.ds(off, CH)].astype(jnp.float32)
                t = t_ref[:, pl.ds(off, CH)].astype(jnp.float32)
                bce, mn, st = _elem_terms(o, t)
                return a_b + bce, a_m + mn, a_s + st

            nvalid = jnp.where(kg == K - 1, NFULL_LAST, NFULL)
            zero = jnp.zeros((BB, CH), jnp.float32)
            acc_b, acc_m, acc_s = lax.fori_loop(0, nvalid, body, (zero, zero, zero))

        out_ref[...] += _col_update(BB, acc_b, acc_m, acc_s)

        if REM > 0:
            # Ragged tail of the very last feature block: mask stale lanes to
            # (o, t) = (0, 0) BEFORE the logs -> they contribute exactly zero.
            @pl.when(kg == K - 1)
            def _tail():
                off = NFULL_LAST * CH             # static, 128-aligned
                o = o_ref[:, off:off + W_REM].astype(jnp.float32)
                t = t_ref[:, off:off + W_REM].astype(jnp.float32)
                lane = lax.broadcasted_iota(jnp.int32, (BB, W_REM), 1)
                valid = lane < REM
                o = jnp.where(valid, o, 0.0)
                t = jnp.where(valid, t, 0.0)
                bce, mn, st = _elem_terms(o, t)
                out_ref[...] += _col_update(BB, bce, mn, st)

    return kernel


def bce_ruzicka_sim(outputs, targets):
    """BCELoss(mean) - log(mean_i Ruzicka_i).  outputs in (0, 1), same shape as targets."""
    assert outputs.shape == targets.shape
    B = outputs.shape[0]
    o2 = outputs.reshape(B, -1)          # row-major split -> bitcast reshape, no HBM copy
    t2 = targets.reshape(B, -1)
    N = o2.shape[1]

    o_item = jnp.dtype(o2.dtype).itemsize
    t_item = jnp.dtype(t2.dtype).itemsize
    itemsize = max(o_item, t_item)
    smul = 8 * max(1, 4 // min(o_item, t_item))   # dtype sublane multiple: 8 / 16 / 32

    # ---- samples per block (BB): pack small samples, keep register pressure sane ----
    BB_CAP = 32
    if B <= BB_CAP:
        BB = B                                    # block covers the full batch dim (exempt)
    else:
        rows = min(BB_CAP, max(smul,
                               _TARGET_BLOCK_BYTES // max(1, min(N, 8192) * itemsize)))
        BB = max(smul, (min(rows, B) // smul) * smul)
    num_b = -(-B // BB)
    B_pad = num_b * BB

    # ---- feature chunking: CH lanes per register chunk, LBLK lanes per VMEM block ----
    CH0 = 512 if BB <= 8 else (256 if BB <= 16 else 128)
    if N <= CH0:
        CH, LBLK, K = N, N, 1                     # whole sample row in a single chunk
    else:
        CH = CH0
        maxcols = max(CH, (_TARGET_BLOCK_BYTES // (BB * itemsize)) // CH * CH)
        LBLK = min(maxcols, (N // CH) * CH)       # multiple of CH (and 128), <= N
        K = -(-N // LBLK)
    v_last = N - (K - 1) * LBLK                   # valid lanes in the last feature block
    NFULL = LBLK // CH
    NFULL_LAST = v_last // CH
    REM = v_last - NFULL_LAST * CH
    W_REM = _round_up(REM, _LANE) if REM else 0

    # ---- megacore: if batch blocks alone can't span both TensorCores, split K exactly ----
    NSPLIT = 2 if (num_b % 2 == 1 and K % 2 == 0) else 1
    K_SUB = K // NSPLIT

    kernel = _make_kernel(BB=BB, CH=CH, K=K, K_SUB=K_SUB, NFULL=NFULL,
                          NFULL_LAST=NFULL_LAST, REM=REM, W_REM=W_REM)

    in_spec = pl.BlockSpec((BB, LBLK), lambda s, b, k: (b, s * K_SUB + k))
    out_spec = pl.BlockSpec((None, BB, 3), lambda s, b, k: (s, b, 0))

    total = B * N
    cost = pl.CostEstimate(flops=12 * total, transcendentals=2 * total,
                           bytes_accessed=total * (o_item + t_item) + NSPLIT * B_pad * 12)

    parts = pl.pallas_call(
        kernel,
        out_shape=jax.ShapeDtypeStruct((NSPLIT, B_pad, 3), jnp.float32),
        grid=(NSPLIT, num_b, K_SUB),
        in_specs=[in_spec, in_spec],
        out_specs=out_spec,
        compiler_params=pltpu.CompilerParams(
            dimension_semantics=("parallel", "parallel", "arbitrary")),
        cost_estimate=cost,
    )(o2, t2)

    # ---- tiny finalize in JAX on (NSPLIT, B_pad, 3) partials ----
    sums = jnp.sum(parts, axis=0)[:B]             # (B, 3); padded batch rows discarded
    bce_row, min_row, ot_row = sums[:, 0], sums[:, 1], sums[:, 2]
    bce = -jnp.sum(bce_row) / jnp.float32(B * N)
    min_sum = min_row + jnp.float32(_EPS) * N                 # sum(min(o+eps, t+eps))
    max_sum = ot_row - min_row + jnp.float32(_EPS) * N        # sum(max) via min/max identity
    r = jnp.mean(min_sum / max_sum)
    return bce - jnp.log(r)


def _reference(outputs, targets):
    """Pure-JAX reference of the PyTorch forward, for correctness checks."""
    o = outputs.astype(jnp.float32)
    t = targets.astype(jnp.float32)
    bce = jnp.mean(-(t * jnp.maximum(jnp.log(o), -100.0)
                     + (1.0 - t) * jnp.maximum(jnp.log(1.0 - o), -100.0)))
    oe, te = o + 0.5, t + 0.5
    B = o.shape[0]
    mins = jnp.minimum(oe, te).reshape(B, -1).sum(axis=-1)
    maxs = jnp.maximum(oe, te).reshape(B, -1).sum(axis=-1)
    return bce - jnp.log(jnp.mean(mins / maxs))


if __name__ == "__main__":
    key = jax.random.PRNGKey(0)
    keys = jax.random.split(key, 8)

    def run_case(ko, kt, shape):
        o = jax.random.uniform(ko, shape, minval=0.01, maxval=0.99, dtype=jnp.float32)
        t = jax.random.uniform(kt, shape, minval=0.0, maxval=1.0, dtype=jnp.float32)
        loss = bce_ruzicka_sim(o, t)
        jax.block_until_ready(loss)
        ref = _reference(o, t)
        assert jnp.allclose(loss, ref, rtol=1e-4, atol=1e-5), (shape, loss, ref)

    # primary shape: lane-aligned N, single grid step
    run_case(keys[0], keys[1], (2, 4, 16, 16))      # N = 1024
    # non-128-aligned N: full-row block, no padding or masking needed
    run_case(keys[2], keys[3], (2, 3, 7, 11))       # N = 231
    # multi-step reduction + ragged last block (in-kernel lane masking) + megacore K-split
    run_case(keys[4], keys[5], (3, 4, 1, 331))      # N = 1324, K = 2, REM = 300
    # batch larger than the block rows: partial batch block with discarded pad rows
    run_case(keys[6], keys[7], (40, 1, 16, 16))     # N = 256, BB = 32

    print("KERNEL_OK")
</pallas_src>

<mosaic_0001>
module attributes {stable_mosaic.version = 11 : i64} {
  func.func @kernel(%arg0: i32, %arg1: i32, %arg2: i32, %arg3: memref<2x1024xf32, #tpu.memory_space<vmem>>, %arg4: memref<2x1024xf32, #tpu.memory_space<vmem>>, %arg5: memref<1x2x3xf32, #tpu.memory_space<vmem>>) attributes {dimension_semantics = [#tpu.dimension_semantics<parallel>, #tpu.dimension_semantics<parallel>, #tpu.dimension_semantics<arbitrary>], iteration_bounds = array<i64: 1, 1, 1>, scalar_prefetch = 0 : i64, scratch_operands = 0 : i64, tpu.core_type = #tpu.core_type<tc>, window_params = [{transform_indices = @transform_0, window_bounds = array<i64: 2, 1024>}, {transform_indices = @transform_1, window_bounds = array<i64: 2, 1024>}, {transform_indices = @transform_2, window_bounds = array<i64: 1, 2, 3>}]} {
    %c0_i32 = arith.constant 0 : i32
    %0 = arith.cmpi eq, %arg2, %c0_i32 : i32
    %1 = arith.extui %0 : i1 to i32
    %c0_i32_0 = arith.constant 0 : i32
    %2 = arith.cmpi ne, %1, %c0_i32_0 : i32
    scf.if %2 {
      %cst_28 = arith.constant 0.000000e+00 : f32
      %75 = vector.broadcast %cst_28 : f32 to vector<2x3xf32>
      %c0_29 = arith.constant 0 : index
      %c0_30 = arith.constant 0 : index
      %c0_31 = arith.constant 0 : index
      %76 = vector.load %arg5[%c0_29, %c0_30, %c0_31] : memref<1x2x3xf32, #tpu.memory_space<vmem>>, vector<1x2x3xf32>
      %77 = vector.shape_cast %76 : vector<1x2x3xf32> to vector<2x3xf32>
      %78 = vector.shape_cast %75 : vector<2x3xf32> to vector<1x2x3xf32>
      tpu.vector_store %arg5[%c0_29, %c0_30, %c0_31], %78 {strides = array<i32>} : memref<1x2x3xf32, #tpu.memory_space<vmem>>, vector<1x2x3xf32>,
    } else {
    }
    %cst = arith.constant 0.000000e+00 : f32
    %3 = vector.broadcast %cst : f32 to vector<2x512xf32>
    %cst_1 = arith.constant 0.000000e+00 : f32
    %4 = vector.broadcast %cst_1 : f32 to vector<2x512xf32>
    %cst_2 = arith.constant 0.000000e+00 : f32
    %5 = vector.broadcast %cst_2 : f32 to vector<2x512xf32>
    %c0 = arith.constant 0 : index
    %c0_3 = arith.constant 0 : index
    %6 = vector.load %arg3[%c0, %c0_3] : memref<2x1024xf32, #tpu.memory_space<vmem>>, vector<2x512xf32>
    %c0_4 = arith.constant 0 : index
    %c0_5 = arith.constant 0 : index
    %7 = vector.load %arg4[%c0_4, %c0_5] : memref<2x1024xf32, #tpu.memory_space<vmem>>, vector<2x512xf32>
    %8 = math.log %6 : vector<2x512xf32>
    %cst_6 = arith.constant -1.000000e+02 : f32
    %9 = vector.broadcast %cst_6 : f32 to vector<2x512xf32>
    %10 = arith.maximumf %8, %9 : vector<2x512xf32>
    %cst_7 = arith.constant 1.000000e+00 : f32
    %11 = vector.broadcast %cst_7 : f32 to vector<2x512xf32>
    %12 = arith.subf %11, %6 : vector<2x512xf32>
    %13 = math.log %12 : vector<2x512xf32>
    %cst_8 = arith.constant -1.000000e+02 : f32
    %14 = vector.broadcast %cst_8 : f32 to vector<2x512xf32>
    %15 = arith.maximumf %13, %14 : vector<2x512xf32>
    %16 = arith.subf %10, %15 : vector<2x512xf32>
    %17 = arith.mulf %7, %16 : vector<2x512xf32>
    %18 = arith.addf %15, %17 : vector<2x512xf32>
    %19 = arith.minimumf %6, %7 : vector<2x512xf32>
    %20 = arith.addf %6, %7 : vector<2x512xf32>
    %21 = arith.addf %3, %18 : vector<2x512xf32>
    %22 = arith.addf %4, %19 : vector<2x512xf32>
    %23 = arith.addf %5, %20 : vector<2x512xf32>
    %c0_9 = arith.constant 0 : index
    %c512 = arith.constant 512 : index
    %24 = vector.load %arg3[%c0_9, %c512] : memref<2x1024xf32, #tpu.memory_space<vmem>>, vector<2x512xf32>
    %c0_10 = arith.constant 0 : index
    %c512_11 = arith.constant 512 : index
    %25 = vector.load %arg4[%c0_10, %c512_11] : memref<2x1024xf32, #tpu.memory_space<vmem>>, vector<2x512xf32>
    %26 = math.log %24 : vector<2x512xf32>
    %cst_12 = arith.constant -1.000000e+02 : f32
    %27 = vector.broadcast %cst_12 : f32 to vector<2x512xf32>
    %28 = arith.maximumf %26, %27 : vector<2x512xf32>
    %cst_13 = arith.constant 1.000000e+00 : f32
    %29 = vector.broadcast %cst_13 : f32 to vector<2x512xf32>
    %30 = arith.subf %29, %24 : vector<2x512xf32>
    %31 = math.log %30 : vector<2x512xf32>
    %cst_14 = arith.constant -1.000000e+02 : f32
    %32 = vector.broadcast %cst_14 : f32 to vector<2x512xf32>
    %33 = arith.maximumf %31, %32 : vector<2x512xf32>
    %34 = arith.subf %28, %33 : vector<2x512xf32>
    %35 = arith.mulf %25, %34 : vector<2x512xf32>
    %36 = arith.addf %33, %35 : vector<2x512xf32>
    %37 = arith.minimumf %24, %25 : vector<2x512xf32>
    %38 = arith.addf %24, %25 : vector<2x512xf32>
    %39 = arith.addf %21, %36 : vector<2x512xf32>
    %40 = arith.addf %22, %37 : vector<2x512xf32>
    %41 = arith.addf %23, %38 : vector<2x512xf32>
    %c0_15 = arith.constant 0 : index
    %c0_16 = arith.constant 0 : index
    %c0_17 = arith.constant 0 : index
    %42 = vector.load %arg5[%c0_15, %c0_16, %c0_17] : memref<1x2x3xf32, #tpu.memory_space<vmem>>, vector<1x2x3xf32>
    %43 = vector.shape_cast %42 : vector<1x2x3xf32> to vector<2x3xf32>
    %cst_18 = arith.constant dense<0.000000e+00> : vector<2xf32>
    %44 = vector.multi_reduction <add>, %39, %cst_18 [1] : vector<2x512xf32> to vector<2xf32>
    %45 = vector.shape_cast %44 : vector<2xf32> to vector<2x1xf32>
    %cst_19 = arith.constant dense<0.000000e+00> : vector<2xf32>
    %46 = vector.multi_reduction <add>, %40, %cst_19 [1] : vector<2x512xf32> to vector<2xf32>
    %47 = vector.shape_cast %46 : vector<2xf32> to vector<2x1xf32>
    %cst_20 = arith.constant dense<0.000000e+00> : vector<2xf32>
    %48 = vector.multi_reduction <add>, %41, %cst_20 [1] : vector<2x512xf32> to vector<2xf32>
    %49 = vector.shape_cast %48 : vector<2xf32> to vector<2x1xf32>
    %50 = tpu.iota {dimensions = array<i32: 1>} : vector<2x3xi32>
    %c0_i32_21 = arith.constant 0 : i32
    %51 = vector.broadcast %c0_i32_21 : i32 to vector<2x3xi32>
    %52 = arith.cmpi eq, %50, %51 : vector<2x3xi32>
    %cst_22 = arith.constant 0.000000e+00 : f32
    %53 = vector.shape_cast %45 : vector<2x1xf32> to vector<2x1xf32>
    %54 = vector.broadcast %53 : vector<2x1xf32> to vector<2x3xf32>
    %55 = vector.broadcast %cst_22 : f32 to vector<2x3xf32>
    %56 = arith.select %52, %54, %55 : vector<2x3xi1>, vector<2x3xf32>
    %c1_i32 = arith.constant 1 : i32
    %57 = vector.broadcast %c1_i32 : i32 to vector<2x3xi32>
    %58 = arith.cmpi eq, %50, %57 : vector<2x3xi32>
    %cst_23 = arith.constant 0.000000e+00 : f32
    %59 = vector.shape_cast %47 : vector<2x1xf32> to vector<2x1xf32>
    %60 = vector.broadcast %59 : vector<2x1xf32> to vector<2x3xf32>
    %61 = vector.broadcast %cst_23 : f32 to vector<2x3xf32>
    %62 = arith.select %58, %60, %61 : vector<2x3xi1>, vector<2x3xf32>
    %63 = arith.addf %56, %62 : vector<2x3xf32>
    %c2_i32 = arith.constant 2 : i32
    %64 = vector.broadcast %c2_i32 : i32 to vector<2x3xi32>
    %65 = arith.cmpi eq, %50, %64 : vector<2x3xi32>
    %cst_24 = arith.constant 0.000000e+00 : f32
    %66 = vector.shape_cast %49 : vector<2x1xf32> to vector<2x1xf32>
    %67 = vector.broadcast %66 : vector<2x1xf32> to vector<2x3xf32>
    %68 = vector.broadcast %cst_24 : f32 to vector<2x3xf32>
    %69 = arith.select %65, %67, %68 : vector<2x3xi1>, vector<2x3xf32>
    %70 = arith.addf %63, %69 : vector<2x3xf32>
    %71 = arith.addf %43, %70 : vector<2x3xf32>
    %c0_25 = arith.constant 0 : index
    %c0_26 = arith.constant 0 : index
    %c0_27 = arith.constant 0 : index
    %72 = vector.load %arg5[%c0_25, %c0_26, %c0_27] : memref<1x2x3xf32, #tpu.memory_space<vmem>>, vector<1x2x3xf32>
    %73 = vector.shape_cast %72 : vector<1x2x3xf32> to vector<2x3xf32>
    %74 = vector.shape_cast %71 : vector<2x3xf32> to vector<1x2x3xf32>
    tpu.vector_store %arg5[%c0_25, %c0_26, %c0_27], %74 {strides = array<i32>} : memref<1x2x3xf32, #tpu.memory_space<vmem>>, vector<1x2x3xf32>,
    return
  }
  func.func @transform_0(%arg0: i32, %arg1: i32, %arg2: i32) -> (i32, i32) {
    %c1_i32 = arith.constant 1 : i32
    %0 = arith.muli %arg0, %c1_i32 : i32
    %1 = arith.addi %0, %arg2 : i32
    %c0_i32 = arith.constant 0 : i32
    return %arg1, %1 : i32, i32
  }
  func.func @transform_1(%arg0: i32, %arg1: i32, %arg2: i32) -> (i32, i32) {
    %c1_i32 = arith.constant 1 : i32
    %0 = arith.muli %arg0, %c1_i32 : i32
    %1 = arith.addi %0, %arg2 : i32
    %c0_i32 = arith.constant 0 : i32
    return %arg1, %1 : i32, i32
  }
  func.func @transform_2(%arg0: i32, %arg1: i32, %arg2: i32) -> (i32, i32, i32) {
    %c0_i32 = arith.constant 0 : i32
    %c0_i32_0 = arith.constant 0 : i32
    return %arg0, %arg1, %c0_i32 : i32, i32, i32
  }
}

</mosaic_0001>

<bundles_post_ra>
// kernel: tpu_custom_call.1
= control target key start
LH: loop header
LB: loop body
LE: loop exit
PB: predicated region body
PF: predicated region fallthrough
CT: control target
= control target key end

     0   :  { %7 = vsyncpa [#allocation3], 0  ;;  %s369_s0 = inlined_call_operand.hbm [shape: f32[2,1024], index: 0, kind: input, shape index: {}]   ;;  %s370_s1 = inlined_call_operand.hbm [shape: f32[2,1024], index: 1, kind: input, shape index: {}]   ;;  %s371_s2 = inlined_call_operand.hbm [shape: f32[1,2,3], index: 2, kind: output, shape index: {}]  }
   0x1   :  { %8 = vsyncpa [#allocation6], 0 }
   0x2   :  { %9 = vsyncpa [#allocation4], 0  ;;  %s297_s9 = smov [#allocation2]   ;;  %s298_s11 = smov [#allocation5]  }
   0x3   :  { %s20_s10 = sshll.u32 %s297_s9, 4  ;;  %s34_s12 = sshll.u32 %s298_s11, 4  ;;  %s21_s10 = int_to_ptr.vmem [resolvable:$true] %s20_s10  ;;  %s35_s12 = int_to_ptr.vmem [resolvable:$true] %s34_s12 }
   0x4   :  { %s225_s15 = scalar_lea.hbm %s369_s0, 256 }
   0x5   :  { %p226_p0 = scmp.ne.s32.totalorder %s369_s0, %s225_s15  ;;  %p229_p1 = scmp.lt.u32.totalorder %s225_s15, %s369_s0 }
   0x7   :  { %p231_p2 = pnand %p229_p1, %p226_p0 }
   0x9   :  { %234 = shalt.err (!%p231_p2)
}
   0xa   :  { %s235_s20 = scalar_lea.vmem %s21_s10, 256  ;;  %p240_p4 = scmp.lt.s32.totalorder %s21_s10, %s21_s10 }
   0xb   :  { %p236_p3 = scmp.ne.s32.totalorder %s21_s10, %s235_s20  ;;  %p241_p5 = scmp.lt.s32.totalorder %s235_s20, %s235_s20 }
   0xd   :  { %p242_p6 = por %p241_p5, %p240_p4 }
   0xf   :  { %p243_p7 = pnand %p242_p6, %p236_p3 }
  0x11   :  { %246 = shalt.err (!%p243_p7)
}
  0x12   :  { %23 = dma.hbm_to_vmem [thread:$0]  %s369_s0, 256, %s21_s10, [#allocation3]  }
  0x13   :  { %s247_s25 = scalar_lea.hbm %s370_s1, 256 }
  0x14   :  { %p248_p8 = scmp.ne.s32.totalorder %s370_s1, %s247_s25  ;;  %p251_p9 = scmp.lt.u32.totalorder %s247_s25, %s370_s1 }
  0x16   :  { %p253_p10 = pnand %p251_p9, %p248_p8 }
  0x18   :  { %256 = shalt.err (!%p253_p10)
}
  0x19   :  { %s257_s30 = scalar_lea.vmem %s35_s12, 256  ;;  %p262_p12 = scmp.lt.s32.totalorder %s35_s12, %s35_s12 }
  0x1a   :  { %p258_p11 = scmp.ne.s32.totalorder %s35_s12, %s257_s30  ;;  %p263_p13 = scmp.lt.s32.totalorder %s257_s30, %s257_s30 }
  0x1c   :  { %p264_p0 = por %p263_p13, %p262_p12 }
  0x1e   :  { %p265_p1 = pnand %p264_p0, %p258_p11 }
  0x20   :  { %268 = shalt.err (!%p265_p1)
}
  0x21   :  { %37 = dma.hbm_to_vmem [thread:$0]  %s370_s1, 256, %s35_s12, [#allocation6]  }
  0x22   :  { %291 = dma.done.wait [#allocation3], 256  }
  0x23   :  { %292 = vsyncadd [#allocation3], 4294967040 }
  0x24   :  { %293 = dma.done.wait [#allocation6], 256  }
  0x25   :  { %294 = vsyncadd [#allocation6], 4294967040  ;;  %vm52_vm0 = vcmask 17408   ;;  %v299_v0 = vmov 0.0   ;;  %v300_v1 = vmov 1983009808   ;;  %v94_v3 = vlaneseq }
  0x26   :  { %53 = vst.msk [vmem:[#allocation7] sm:$0x3] %vm52_vm0, %v299_v0  ;;  %v92_v2 = vunpack.c.l.s4 %v300_v1  ;;  %v54_v4 = vld [vmem:[#allocation2] sm:$0xff]  ;;  %v71_v5 = vld [vmem:[#allocation2 + $0x8] sm:$0xff]  ;;  %v55_v8 = vld [vmem:[#allocation5] sm:$0xff]  ;;  %vm111_vm1 = vcmask 1041408  }
  0x27   :  { %v95_v7 = vshrl.u32 %v94_v3, 7  ;;  %217 = vlog2.f32 %v54_v4  ;;  %v59_v9 = vsub.f32 1.0, %v54_v4  ;;  %v72_v10 = vld [vmem:[#allocation5 + $0x8] sm:$0xff]  ;;  %v76_v11 = vsub.f32 1.0, %v71_v5  ;;  %s301_s1 = smov [#allocation7]  }
  0x28   :  { %v93_v6 = vunpack.c.0.s8 %v92_v2  ;;  %219 = vlog2.f32 %v71_v5  ;;  %v67_v12 = vadd.f32 %v55_v8, %v54_v4  ;;  %v84_v13 = vadd.f32 %v72_v10, %v71_v5  ;;  %s202_s4 = sshll.u32 %s301_s1, 4  ;;  %s203_s4 = int_to_ptr.vmem [resolvable:$true] %s202_s4 }
  0x29   :  { %221 = vlog2.f32 %v59_v9  ;;  %v66_v23 = vmin.f32 %v54_v4, %v55_v8  ;;  %v83_v24 = vmin.f32 %v71_v5, %v72_v10  ;;  %s269_s5 = scalar_lea.vmem %s203_s4, 32  ;;  %p274_p3 = scmp.lt.s32.totalorder %s203_s4, %s203_s4 }
  0x2a   :  { %223 = vlog2.f32 %v76_v11  ;;  %v96_v14 = vsub.s32 %v93_v6, %v95_v7  ;;  %v87_v15 = vadd.f32 %v84_v13, %v67_v12  ;;  %v184_v11 = vand.u32 127, %v94_v3  ;;  %p270_p2 = scmp.ne.s32.totalorder %s203_s4, %s269_s5  ;;  %p275_p4 = scmp.lt.s32.totalorder %s269_s5, %s269_s5 }
  0x2b   :  { %v86_v39 = vadd.f32 %v83_v24, %v66_v23 }
  0x2c   :  { %v153_v16 = vcombine.high %v87_v15, %v87_v15  ;;  %v160_v17 = vrot.slane %v87_v15, %v96_v14  ;;  %vm185_vm2 = vcmp.eq.s32.totalorder %v184_v11, 0  ;;  %vm187_vm3 = vcmp.eq.s32.totalorder %v184_v11, 1  ;;  %p276_p5 = por %p275_p4, %p274_p3 }
  0x2d   :  { %v129_v45 = vrot.slane %v86_v39, %v96_v14  ;;  %v122_v49 = vcombine.high %v86_v39, %v86_v39  ;;  %vm190_vm4 = vcmp.eq.s32.totalorder %v184_v11, 2 }
  0x2e   :  { %v167_v18 = vrot.slane %v153_v16, %v96_v14  ;;  %v168_v19 = vcombine.high %v160_v17, %v160_v17  ;;  %v174_v20 = vsel %vm111_vm1, %v160_v17, 0.0  ;;  %p277_p6 = pnand %p276_p5, %p270_p2 }
  0x2f   :  { %v137_v51 = vcombine.high %v129_v45, %v129_v45  ;;  %v136_v53 = vrot.slane %v122_v49, %v96_v14  ;;  %v143_v56 = vsel %vm111_vm1, %v129_v45, 0.0 }
  0x30   :  { %v169_v21 = vcombine.high %v167_v18, %v167_v18  ;;  %v175_v25 = vsel %vm111_vm1, %v168_v19, 0.0  ;;  %v177_v26 = vsel %vm111_vm1, %v167_v18, 0.0  ;;  %v88_v19 = vld [vmem:[#allocation7] sm:$0x3] }
  0x31   :  { %v218_v22 = vpop.eup %217  ;;  %v176_v29 = vadd.f32 %v175_v25, %v174_v20  ;;  %v144_v57 = vsel %vm111_vm1, %v137_v51, 0.0  ;;  %v138_v61 = vcombine.high %v136_v53, %v136_v53  ;;  %v146_v2 = vsel %vm111_vm1, %v136_v53, 0.0 }
  0x32   :  { %v220_v27 = vpop.eup %219  ;;  %v57_v28 = vmul.f32 0.6931472, %v218_v22  ;;  %v179_v32 = vsel %vm111_vm1, %v169_v21, 0.0  ;;  %v145_v62 = vadd.f32 %v144_v57, %v143_v56 }
  0x33   :  { %v222_v30 = vpop.eup %221  ;;  %v74_v31 = vmul.f32 0.6931472, %v220_v27  ;;  %v178_v36 = vadd.f32 %v177_v26, %v176_v29 }
  0x34   :  { %v224_v33 = vpop.eup %223  ;;  %v58_v34 = vmax.f32 %v57_v28, -100.0  ;;  %v61_v35 = vmul.f32 0.6931472, %v222_v30  ;;  %v147_v7 = vadd.f32 %v146_v2, %v145_v62 }
  0x35   :  { %v75_v37 = vmax.f32 %v74_v31, -100.0  ;;  %v78_v38 = vmul.f32 0.6931472, %v224_v33  ;;  %v180_v41 = vadd.f32 %v179_v32, %v178_v36 }
  0x36   :  { %v62_v40 = vmax.f32 %v61_v35, -100.0 }
  0x37   :  { %v79_v42 = vmax.f32 %v78_v38, -100.0  ;;  %181 = vadd.xlane.f32.xlu1 %v180_v41 }
  0x38   :  { %v63_v43 = vsub.f32 %v58_v34, %v62_v40 }
  0x39   :  { %v80_v44 = vsub.f32 %v75_v37, %v79_v42 }
  0x3a   :  { %v64_v46 = vmul.f32 %v63_v43, %v55_v8  ;;  %v148_v8 = vsel %vm111_vm1, %v138_v61, 0.0 }
  0x3b   :  { %v81_v47 = vmul.f32 %v80_v44, %v72_v10  ;;  %v149_v10 = vadd.f32 %v148_v8, %v147_v7 }
  0x3c   :  { %v65_v48 = vadd.f32 %v64_v46, %v62_v40 }
  0x3d   :  { %v82_v50 = vadd.f32 %v81_v47, %v79_v42 }
  0x3f   :  { %v85_v52 = vadd.f32 %v82_v50, %v65_v48 }
  0x41   :  { %v90_v54 = vcombine.high %v85_v52, %v85_v52  ;;  %v97_v55 = vrot.slane %v85_v52, %v96_v14 }
  0x43   :  { %v104_v58 = vrot.slane %v90_v54, %v96_v14  ;;  %v105_v59 = vcombine.high %v97_v55, %v97_v55  ;;  %v112_v60 = vsel %vm111_vm1, %v97_v55, 0.0 }
  0x45   :  { %v106_v63 = vcombine.high %v104_v58, %v104_v58  ;;  %v113_v0 = vsel %vm111_vm1, %v105_v59, 0.0  ;;  %v115_v1 = vsel %vm111_vm1, %v104_v58, 0.0 }
  0x46   :  { %v114_v4 = vadd.f32 %v113_v0, %v112_v60 }
  0x47   :  { %v117_v5 = vsel %vm111_vm1, %v106_v63, 0.0 }
  0x48   :  { %v116_v6 = vadd.f32 %v115_v1, %v114_v4 }
  0x4a   :  { %v118_v9 = vadd.f32 %v117_v5, %v116_v6 }
  0x4c   :  { %119 = vadd.xlane.f32.xlu0 %v118_v9 }
  0x50   :  { %150 = vadd.xlane.f32.xlu0 %v149_v10 }
  0xc4   :  { %v182_v13 = vpop.xlane.xlu1 %181 }
  0xc5   :  { %v191_v17 = vsel %vm190_vm4, %v182_v13, 0.0 }
  0xd9   :  { %v120_v12 = vpop.xlane.xlu0 %119 }
  0xda   :  { %v186_v15 = vsel %vm185_vm2, %v120_v12, 0.0 }
  0xdd   :  { %v151_v14 = vpop.xlane.xlu0 %150 }
  0xde   :  { %v188_v16 = vsel %vm187_vm3, %v151_v14, 0.0 }
  0xdf   :  { %v189_v18 = vadd.f32 %v188_v16, %v186_v15 }
  0xe1   :  { %v192_v20 = vadd.f32 %v191_v17, %v189_v18 }
  0xe3   :  { %v193_v21 = vadd.f32 %v192_v20, %v88_v19 }
  0xe5   :  { %195 = vst.msk [vmem:[#allocation7] sm:$0x3] %vm52_vm0, %v193_v21 }
  0xe6   :  { %280 = shalt.err (!%p277_p6)
}
  0xe7   :  { %s281_s8 = scalar_lea.hbm %s371_s2, 32 }
  0xe8   :  { %p282_p7 = scmp.ne.s32.totalorder %s371_s2, %s281_s8  ;;  %p285_p8 = scmp.lt.u32.totalorder %s281_s8, %s371_s2 }
  0xea   :  { %p287_p9 = pnand %p285_p8, %p282_p7 }
  0xec   :  { %290 = shalt.err (!%p287_p9)
}
  0xed   :  { %205 = dma.vmem_to_hbm [thread:$0]  %s203_s4, 32, %s371_s2, [#allocation4]  }
  0xee   :  { %295 = dma.done.wait [#allocation4], 32  }
  0xef   :  { %296 = vsyncadd [#allocation4], 4294967264 }
  0xf0   :  { %209 = vsyncpa [#allocation3], 1 }
  0xf1   :  { %210 = vsyncpa [#allocation6], 1 }
  0xf2   :  { %211 = vsyncpa [#allocation4], 1 }

</bundles_post_ra>
